<compile_context>
chip_gen: v6e
topology: v6e:2x2x1
jax: 0.10.0
libtpu: 0.0.40
codegen_flags: <defaults>
</compile_context>

<pallas_src>
import jax
import jax.numpy as jnp
from jax import lax
from jax.experimental import pallas as pl
from jax.experimental.pallas import tpu as pltpu


def _make_divisible(v, divisor, min_value=None):
    if min_value is None:
        min_value = divisor
    new_v = max(min_value, int(v + divisor / 2) // divisor * divisor)
    if new_v < 0.9 * v:
        new_v += divisor
    return new_v


# ---------------- module configuration ----------------
BATCH = 2
C = 4                                  # channels
H = W = 16
HW = H * W                             # 256 -> 2 x 128 lanes, unmasked vst path
RED = _make_divisible(C // 4, 8)       # SE bottleneck width = 8

BC = BATCH * C                         # flat row count of the activation slab = 8
BR = BATCH * RED                       # flat width of the hidden excitation    = 16

# packed parameter slab layout (built ONCE at init, single DMA operand):
#   rows [0, BC),  cols [0, BR)        : block-diag fc1_w^T, pre-scaled by 1/HW
#   rows [0, BC),  cols [BR, 2*BR)     : block-diag fc2_w,   pre-scaled by 1/6
#   rows [0, BC),  col  2*BR           : (fc2_b + 3) / 6     (column)
#   row  BC,       cols [0, BR)        : fc1_b               (row)
PACK_ROWS = BC + 1                     # 9
PACK_COLS = 2 * BR + 1                 # 33


# ---------------- the Pallas kernel ----------------
def se_kernel(x_ref, p_ref, o_ref):
    x = x_ref[...].astype(jnp.float32)                    # (BC, HW)
    p = p_ref[...]                                        # (PACK_ROWS, PACK_COLS)

    w1t = p[0:BC, 0:BR]                                   # (BC, BR) fc1^T block-diag, /HW
    w2 = p[0:BC, BR:2 * BR]                               # (BC, BR) fc2 block-diag,   /6
    b2 = p[0:BC, 2 * BR:2 * BR + 1]                       # (BC, 1)  (fc2_b + 3)/6
    b1 = p[BC:BC + 1, 0:BR]                               # (1, BR)  fc1_b

    # ---- squeeze: per-row (= per batch,channel) sum over HW; 1/HW folded into w1t ----
    pooled = jnp.sum(x, axis=-1, keepdims=True)           # (BC, 1)

    # ---- excitation FC1 + ReLU: sublane reduce -> row vector, stays on the VPU ----
    z = jnp.sum(w1t * pooled, axis=0, keepdims=True) + b1  # (1, BR)
    z = jnp.maximum(z, 0.0)

    # ---- excitation FC2 + folded h_sigmoid: lane reduce -> column vector ----
    s = jnp.sum(w2 * z, axis=-1, keepdims=True) + b2       # (BC, 1)
    s = jnp.clip(s, 0.0, 1.0)                              # relu6(v+3)/6 with affine folded

    # ---- scale: lane-broadcast over the (BC, HW) slab ----
    o_ref[...] = (x * s).astype(o_ref.dtype)


# ---------------- parameter packing (runs ONCE, outside the hot path) ----------------
def pack_params(p, batch, hw):
    red, c = p["fc1_w"].shape
    bc, br = batch * c, batch * red

    w1s = (p["fc1_w"] / float(hw)).astype(jnp.float32)     # fold 1/HW (mean -> sum)
    w2s = (p["fc2_w"] / 6.0).astype(jnp.float32)           # fold h_sigmoid scale
    b1 = p["fc1_b"].astype(jnp.float32)
    b2s = ((p["fc2_b"] + 3.0) / 6.0).astype(jnp.float32)    # fold h_sigmoid shift

    w1t_bd = jnp.zeros((bc, br), jnp.float32)
    w2_bd = jnp.zeros((bc, br), jnp.float32)
    for b in range(batch):                                  # static, init-time only
        w1t_bd = w1t_bd.at[b * c:(b + 1) * c, b * red:(b + 1) * red].set(w1s.T)
        w2_bd = w2_bd.at[b * c:(b + 1) * c, b * red:(b + 1) * red].set(w2s)

    packed = jnp.zeros((bc + 1, 2 * br + 1), jnp.float32)
    packed = packed.at[0:bc, 0:br].set(w1t_bd)
    packed = packed.at[0:bc, br:2 * br].set(w2_bd)
    packed = packed.at[0:bc, 2 * br].set(jnp.tile(b2s, (batch,)))
    packed = packed.at[bc, 0:br].set(jnp.tile(b1, (batch,)))
    return packed


# ---------------- wrapper ----------------
@jax.jit
def se_layer(x, packed):
    B, Cc, Hh, Ww = x.shape
    assert Cc == C and Hh == H and Ww == W and B == BATCH
    x_flat = x.reshape(BC, HW)

    out_flat = pl.pallas_call(
        se_kernel,
        out_shape=jax.ShapeDtypeStruct((BC, HW), x.dtype),
        grid=(1,),
        in_specs=[
            pl.BlockSpec((BC, HW), lambda i: (0, 0)),
            pl.BlockSpec((PACK_ROWS, PACK_COLS), lambda i: (0, 0)),
        ],
        out_specs=pl.BlockSpec((BC, HW), lambda i: (0, 0)),
        input_output_aliases={0: 0},                       # pure in-place scale
        compiler_params=pltpu.CompilerParams(
            dimension_semantics=("arbitrary",)),
    )(x_flat, packed)
    return out_flat.reshape(B, Cc, Hh, Ww)


# ---------------- deterministic parameter init ----------------
def init_params(key):
    k1, k2, k3, k4 = jax.random.split(key, 4)
    return {
        "fc1_w": 0.3 * jax.random.normal(k1, (RED, C), jnp.float32),
        "fc1_b": 0.1 * jax.random.normal(k2, (RED,), jnp.float32),
        "fc2_w": 0.3 * jax.random.normal(k3, (C, RED), jnp.float32),
        "fc2_b": 0.1 * jax.random.normal(k4, (C,), jnp.float32),
    }


# ---------------- pure-JAX reference (for verification) ----------------
def reference(x, p):
    prec = lax.Precision.HIGHEST
    y = x.mean(axis=(2, 3))                                            # (B, C)
    y = jnp.einsum('bc,rc->br', y, p["fc1_w"], precision=prec) + p["fc1_b"]
    y = jnp.maximum(y, 0.0)
    y = jnp.einsum('br,cr->bc', y, p["fc2_w"], precision=prec) + p["fc2_b"]
    y = jnp.clip(y + 3.0, 0.0, 6.0) / 6.0
    return x * y[:, :, None, None]


if __name__ == "__main__":
    key = jax.random.PRNGKey(0)
    kx, kp = jax.random.split(key)
    x = jax.random.normal(kx, (BATCH, C, H, W), jnp.float32)
    params = init_params(kp)
    packed = jax.block_until_ready(pack_params(params, BATCH, HW))  # once, not per call

    out = jax.block_until_ready(se_layer(x, packed))
    ref = reference(x, params)

    assert out.shape == (BATCH, C, H, W)
    err = float(jnp.max(jnp.abs(out - ref)))
    if err < 1e-3:
        print("KERNEL_OK")
    else:
        print("MISMATCH max_abs_err=", err)
</pallas_src>

<mosaic_0001>
module attributes {stable_mosaic.version = 11 : i64} {
  func.func @se_kernel(%arg0: i32, %arg1: memref<8x256xf32, #tpu.memory_space<vmem>>, %arg2: memref<9x33xf32, #tpu.memory_space<vmem>>, %arg3: memref<8x256xf32, #tpu.memory_space<vmem>>) attributes {dimension_semantics = [#tpu.dimension_semantics<arbitrary>], iteration_bounds = array<i64: 1>, scalar_prefetch = 0 : i64, scratch_operands = 0 : i64, tpu.core_type = #tpu.core_type<tc>, window_params = [{pipeline_mode = #tpu.pipeline_mode<synchronous>, transform_indices = @transform_0, window_bounds = array<i64: 8, 256>}, {pipeline_mode = #tpu.pipeline_mode<synchronous>, transform_indices = @transform_1, window_bounds = array<i64: 9, 33>}, {pipeline_mode = #tpu.pipeline_mode<synchronous>, transform_indices = @transform_2, window_bounds = array<i64: 8, 256>}]} {
    %c0 = arith.constant 0 : index
    %c0_0 = arith.constant 0 : index
    %0 = vector.load %arg1[%c0, %c0_0] : memref<8x256xf32, #tpu.memory_space<vmem>>, vector<8x256xf32>
    %c0_1 = arith.constant 0 : index
    %c0_2 = arith.constant 0 : index
    %1 = vector.load %arg2[%c0_1, %c0_2] : memref<9x33xf32, #tpu.memory_space<vmem>>, vector<9x33xf32>
    %2 = vector.extract_strided_slice %1 {offsets = [0, 0], sizes = [8, 16], strides = [1, 1]} : vector<9x33xf32> to vector<8x16xf32>
    %3 = vector.extract_strided_slice %1 {offsets = [0, 16], sizes = [8, 16], strides = [1, 1]} : vector<9x33xf32> to vector<8x16xf32>
    %4 = vector.extract_strided_slice %1 {offsets = [0, 32], sizes = [8, 1], strides = [1, 1]} : vector<9x33xf32> to vector<8x1xf32>
    %5 = vector.extract_strided_slice %1 {offsets = [8, 0], sizes = [1, 16], strides = [1, 1]} : vector<9x33xf32> to vector<1x16xf32>
    %cst = arith.constant dense<0.000000e+00> : vector<8xf32>
    %6 = vector.multi_reduction <add>, %0, %cst [1] : vector<8x256xf32> to vector<8xf32>
    %7 = vector.shape_cast %6 : vector<8xf32> to vector<8x1xf32>
    %8 = vector.broadcast %7 : vector<8x1xf32> to vector<8x16xf32>
    %9 = arith.mulf %2, %8 : vector<8x16xf32>
    %cst_3 = arith.constant dense<0.000000e+00> : vector<16xf32>
    %10 = vector.multi_reduction <add>, %9, %cst_3 [0] : vector<8x16xf32> to vector<16xf32>
    %11 = vector.shape_cast %10 : vector<16xf32> to vector<1x16xf32>
    %12 = arith.addf %11, %5 : vector<1x16xf32>
    %cst_4 = arith.constant 0.000000e+00 : f32
    %13 = vector.broadcast %cst_4 : f32 to vector<1x16xf32>
    %14 = arith.maximumf %12, %13 : vector<1x16xf32>
    %15 = vector.broadcast %14 : vector<1x16xf32> to vector<8x16xf32>
    %16 = arith.mulf %3, %15 : vector<8x16xf32>
    %cst_5 = arith.constant dense<0.000000e+00> : vector<8xf32>
    %17 = vector.multi_reduction <add>, %16, %cst_5 [1] : vector<8x16xf32> to vector<8xf32>
    %18 = vector.shape_cast %17 : vector<8xf32> to vector<8x1xf32>
    %19 = arith.addf %18, %4 : vector<8x1xf32>
    %cst_6 = arith.constant 0.000000e+00 : f32
    %cst_7 = arith.constant 1.000000e+00 : f32
    %20 = vector.broadcast %cst_6 : f32 to vector<8x1xf32>
    %21 = arith.maximumf %20, %19 : vector<8x1xf32>
    %22 = vector.broadcast %cst_7 : f32 to vector<8x1xf32>
    %23 = arith.minimumf %22, %21 : vector<8x1xf32>
    %24 = vector.broadcast %23 : vector<8x1xf32> to vector<8x256xf32>
    %25 = arith.mulf %0, %24 : vector<8x256xf32>
    %c0_8 = arith.constant 0 : index
    %c0_9 = arith.constant 0 : index
    %26 = vector.load %arg3[%c0_8, %c0_9] : memref<8x256xf32, #tpu.memory_space<vmem>>, vector<8x256xf32>
    tpu.vector_store %arg3[%c0_8, %c0_9], %25 {strides = array<i32>} : memref<8x256xf32, #tpu.memory_space<vmem>>, vector<8x256xf32>,
    return
  }
  func.func @transform_0(%arg0: i32) -> (i32, i32) {
    %c0_i32 = arith.constant 0 : i32
    %c0_i32_0 = arith.constant 0 : i32
    %c0_i32_1 = arith.constant 0 : i32
    return %c0_i32, %c0_i32_0 : i32, i32
  }
  func.func @transform_1(%arg0: i32) -> (i32, i32) {
    %c0_i32 = arith.constant 0 : i32
    %c0_i32_0 = arith.constant 0 : i32
    %c0_i32_1 = arith.constant 0 : i32
    return %c0_i32, %c0_i32_0 : i32, i32
  }
  func.func @transform_2(%arg0: i32) -> (i32, i32) {
    %c0_i32 = arith.constant 0 : i32
    %c0_i32_0 = arith.constant 0 : i32
    %c0_i32_1 = arith.constant 0 : i32
    return %c0_i32, %c0_i32_0 : i32, i32
  }
}

</mosaic_0001>

<bundles_post_ra>
// kernel: se_layer.1
= control target key start
LH: loop header
LB: loop body
LE: loop exit
PB: predicated region body
PF: predicated region fallthrough
CT: control target
= control target key end

     0   :  { %vm19_vm0 = vcmask 130048   ;;  %v29_v10 = vlaneseq  ;;  %s65_s16 = smov 16   ;;  %s66_s17 = smov 112   ;;  %v67_v24 = vmov 32   ;;  %s103_s0 = inlined_call_operand.vmem [shape: f32[8,256], index: 0, kind: input, shape index: {}, may-alias: {0,2}]   ;;  %s104_s1 = inlined_call_operand.vmem [shape: f32[9,33], index: 1, kind: input, shape index: {}]   ;;  %s105_s2 = inlined_call_operand.vmem [shape: f32[8,256], index: 2, kind: output, shape index: {}, may-alias: {0,2}]  }
   0x1   :  { %v11_v0 = vld [vmem:[%s103_s0] sm:$0xff]  ;;  %v12_v1 = vld [vmem:[%s103_s0 + $0x8] sm:$0xff]  ;;  %64 = vset.pattern.permute.xlu0 %v67_v24 }
   0x2   :  { %v15_v2 = vadd.f32 %v12_v1, %v11_v0  ;;  %v13_v3 = vld [vmem:[%s104_s1] sm:$0xff]  ;;  %v30_v13 = vshrl.u32 %v29_v10, 7  ;;  %v14_v14 = vld [vmem:[%s104_s1 + $0x8] sm:$0x1] }
   0x4   :  { %16 = vadd.xlane.f32.xlu0 %v15_v2  ;;  %v31_v17 = vsub.s32 0, %v30_v13 }
  0x8d   :  { %v17_v4 = vpop.xlane.xlu0 %16 }
  0x8e   :  { %v18_v5 = vmul.f32 %v17_v4, %v13_v3 }
  0x90   :  { %v20_v6 = vsel %vm19_vm0, %v18_v5, 0.0 }
  0x91   :  { %v21_v7 = vrot.slane %v20_v6, 4 }
  0x93   :  { %v22_v8 = vadd.f32 %v21_v7, %v20_v6 }
  0x95   :  { %v23_v9 = vrot.slane %v22_v8, 2 }
  0x97   :  { %v24_v11 = vadd.f32 %v23_v9, %v22_v8 }
  0x99   :  { %v25_v12 = vrot.slane %v24_v11, 1 }
  0x9b   :  { %v26_v15 = vadd.f32 %v25_v12, %v24_v11 }
  0x9d   :  { %v27_v16 = vadd.f32 %v26_v15, %v14_v14 }
  0x9f   :  { %v28_v18 = vmax.f32 %v27_v16, 0.0 }
  0xa1   :  { %v32_v19 = vrot.slane %v28_v18, %v31_v17 }
  0xa3   :  { %34 = vrot.lane.b32.xlu0 %v32_v19, %s65_s16 }
 0x115   :  { %v35_v20 = vpop.permute.xlu0 %34 }
 0x116   :  { %v37_v21 = vmul.f32 %v35_v20, %v13_v3 }
 0x118   :  { %39 = vrot.lane.b32.xlu1 %v37_v21, %s66_s17 }
 0x18a   :  { %v40_v22 = vpop.permute.xlu1 %39 }
 0x18b   :  { %v42_v23 = vsel %vm19_vm0, %v40_v22, 0.0 }
 0x18c   :  { %43 = vadd.xlane.f32.xlu1 %v42_v23 }
 0x215   :  { %v44_v25 = vpop.xlane.xlu1 %43 }
 0x216   :  { %v45_v26 = vadd.f32 %v44_v25, %v13_v3 }
 0x218   :  { %v46_v27 = vmax.f32 %v45_v26, 0.0 }
 0x21a   :  { %v47_v28 = vmin.f32 %v46_v27, 1.0 }
 0x21c   :  { %50 = vperm.xlu0 %64, %v47_v28  }
 0x297   :  { %v51_v29 = vpop.permute.xlu0 %50 }
 0x298   :  { %v53_v30 = vmul.f32 %v51_v29, %v11_v0  ;;  %v54_v31 = vmul.f32 %v51_v29, %v12_v1 }
 0x29a   :  { %55 = vst [vmem:[%s105_s2] sm:$0xff] %v53_v30  ;;  %56 = vst [vmem:[%s105_s2 + $0x8] sm:$0xff] %v54_v31 }

</bundles_post_ra>
